<compile_context>
chip_gen: v7x
topology: tpu7x:2x2x1
jax: 0.10.0
libtpu: 0.0.40
codegen_flags: <defaults>
</compile_context>

<pallas_src>
import functools

import jax
import jax.numpy as jnp
from jax import lax
from jax.experimental import pallas as pl
from jax.experimental.pallas import tpu as pltpu

EPS = 1e-5


def _round_up(x, m):
    return (x + m - 1) // m * m


def _device_kind():
    try:
        return jax.devices()[0].device_kind.lower()
    except Exception:
        return ""


def _vmem_capacity_bytes():
    try:
        return int(pltpu.get_tpu_info().vmem_capacity_bytes)
    except Exception:
        return 64 << 20          # conservative: v7x per-TensorCore VMEM


def _sgu_kernel(u_ref, v_ref, gamma_ref, beta_ref, w_ref, bias_ref, o_ref,
                vnorm_ref, *, c_real, s_real, sp, ts, w_resident, gate_in_f32):
    # u_ref    : (1, TS, Cp)  seq tile of the gating half (x dtype)
    # v_ref    : (1, Sp, Cp)  full per-batch slab of the normed half (x dtype)
    # gamma_ref, beta_ref : (1, Cp) f32   LayerNorm affine (zero padded)
    # w_ref    : (Sp, Sp) bf16 resident  |  (TS, Sp) bf16 streamed tile
    # bias_ref : (TS, 1) f32              seq-mixing bias tile
    # o_ref    : (1, TS, Cp)
    # vnorm_ref: (Sp, Cp) bf16 VMEM scratch, persists across the seq-tile axis
    s_tile = pl.program_id(1)

    # LayerNorm the whole v slab once per batch element.
    @pl.when(s_tile == 0)
    def _():
        v = v_ref[0].astype(jnp.float32)                      # (Sp, Cp)
        inv_c = 1.0 / c_real
        # Channel padding is zero, so padded lanes contribute nothing to either
        # moment; one traversal of v gives exact mean / E[v^2] over real chans.
        mean = jnp.sum(v, axis=-1, keepdims=True) * inv_c     # (Sp, 1)
        var = jnp.sum(v * v, axis=-1, keepdims=True) * inv_c - mean * mean
        var = jnp.maximum(var, 0.0)
        vn = (v - mean) * lax.rsqrt(var + EPS)
        vn = vn * gamma_ref[...] + beta_ref[...]              # padded chans -> 0
        if s_real < sp:
            # Explicitly zero padded seq rows so correctness never depends on
            # W's padded columns staying zero.
            rows = lax.broadcasted_iota(jnp.int32, vn.shape, 0)
            vn = jnp.where(rows < s_real, vn, 0.0)
        vnorm_ref[...] = vn.astype(vnorm_ref.dtype)           # bf16 scratch

    # Seq-mixing matmul for this tile on the MXU: bf16 inputs, f32 accumulate.
    if w_resident:
        row0 = pl.multiple_of(s_tile * ts, ts)
        w_tile = w_ref[pl.ds(row0, ts), :]                    # (TS, Sp) bf16
    else:
        w_tile = w_ref[...]                                   # (TS, Sp) bf16
    proj = jnp.dot(w_tile, vnorm_ref[...],
                   preferred_element_type=jnp.float32)        # (TS, Cp) f32
    proj = proj + bias_ref[...]                               # (TS, 1) broadcast

    if gate_in_f32:
        # v5e has no native bf16 VPU path; f32 multiply + one downcast is cheaper.
        o_ref[0] = (u_ref[0].astype(jnp.float32) * proj).astype(o_ref.dtype)
    else:
        u = u_ref[0]
        o_ref[0] = (u * proj.astype(u.dtype)).astype(o_ref.dtype)


def spatial_gating_unit(x, gamma, beta, w, bias):
    """x: (B, S, d_ffn); gamma/beta: (d_ffn//2,); w: (S, S); bias: (S,)."""
    B, S, d_ffn = x.shape
    C = d_ffn // 2

    kind = _device_kind()
    is_v5 = "v5" in kind

    # Lane / MXU friendly padded sizes.
    Cp = _round_up(C, 128)                                   # lane-dense stores
    # v6e/v7x: round Sp to 256 so TS=256 fills the 256-wide MXU M dim and halves
    # grid steps; v5e (4x128 MXU) keeps 128 granularity.
    Sp = _round_up(S, 128) if (is_v5 or S <= 128) else _round_up(S, 256)
    TS = 256 if Sp % 256 == 0 else 128                       # seq tile
    TS = min(TS, Sp)
    n_s = Sp // TS

    # Arrange x so the u half occupies channel block 0 and v channel block 1.
    if C == Cp:
        # Halves already lane-aligned: feed x directly (no extra HBM copies).
        x_in = x if S == Sp else jnp.pad(x, ((0, 0), (0, Sp - S), (0, 0)))
    else:
        # Unaligned channel count (e.g. the toy test): one padded copy.
        # Production callers should pass C % 128 == 0 to stay on the zero-copy path.
        u_h = jnp.pad(x[..., :C], ((0, 0), (0, Sp - S), (0, Cp - C)))
        v_h = jnp.pad(x[..., C:], ((0, 0), (0, Sp - S), (0, Cp - C)))
        x_in = jnp.concatenate([u_h, v_h], axis=-1)

    gamma_p = jnp.pad(gamma.astype(jnp.float32), (0, Cp - C)).reshape(1, Cp)
    beta_p = jnp.pad(beta.astype(jnp.float32), (0, Cp - C)).reshape(1, Cp)
    # Zero-pad W so padded seq rows/cols contribute nothing; bf16 for the MXU.
    w_p = jnp.pad(w, ((0, Sp - S), (0, Sp - S))).astype(jnp.bfloat16)
    bias_p = jnp.pad(bias.astype(jnp.float32), (0, Sp - S)).reshape(Sp, 1)

    # ---- VMEM planning (generation-aware) -------------------------------
    x_bytes = jnp.dtype(x.dtype).itemsize
    cap = _vmem_capacity_bytes()
    budget = max(cap - (8 << 20), 32 << 20)

    def working_set(v_bufs, w_res, w_bufs):
        w_rows = Sp if w_res else TS
        return (v_bufs * Sp * Cp * x_bytes        # raw v slab
                + 2 * TS * Cp * x_bytes           # u tile (double buffered)
                + 2 * TS * Cp * x_bytes           # out tile
                + w_bufs * w_rows * Sp * 2        # W (bf16)
                + Sp * Cp * 2                     # vnorm scratch (bf16)
                + 2 * 2 * 8 * Cp * 4              # gamma + beta (sublane padded)
                + 2 * TS * 128 * 4)               # bias (lane padded)

    # Prefer: resident W + double-buffered v. Under VMEM pressure (v7x: 64 MiB
    # per TensorCore) shed W's second buffer, then the v slab's second buffer
    # (only loses cross-batch prefetch), then fall back to streaming W tiles.
    v_bufs, w_resident, w_bufs = 2, True, 2
    if working_set(v_bufs, w_resident, w_bufs) > budget:
        w_bufs = 1
    if working_set(v_bufs, w_resident, w_bufs) > budget:
        v_bufs = 1
    if working_set(v_bufs, w_resident, w_bufs) > budget:
        w_resident, w_bufs = False, 2
    # TODO(synk): if even this doesn't fit (very long S on v7x), restructure to a
    # K-tiled contraction (grid (B, n_s, n_k), f32 (TS, Cp) accumulator scratch)
    # instead of holding a full (Sp, Cp) vnorm slab.

    vmem_limit = int(working_set(v_bufs, w_resident, w_bufs) * 1.3) + (2 << 20)
    vmem_limit = max(min(vmem_limit, budget), min(32 << 20, budget))

    # ---- Block specs -----------------------------------------------------
    def _spec(shape, index_map, bufs):
        if bufs == 1:
            return pl.BlockSpec(shape, index_map, pipeline_mode=pl.Buffered(1))
        return pl.BlockSpec(shape, index_map)

    # u half: seq-tiled, channel block 0 of x_in.
    u_spec = pl.BlockSpec((1, TS, Cp), lambda b, s: (b, s, 0))
    # v half: full per-batch slab, channel block 1 of x_in.
    # Block index depends only on b -> DMA'd once per batch element.
    v_spec = _spec((1, Sp, Cp), lambda b, s: (b, 0, 1), v_bufs)
    if w_resident:
        # Constant block index -> W is fetched from HBM exactly once per call.
        w_spec = _spec((Sp, Sp), lambda b, s: (0, 0), w_bufs)
    else:
        w_spec = pl.BlockSpec((TS, Sp), lambda b, s: (s, 0))

    gate_in_f32 = is_v5 or x.dtype == jnp.float32

    kernel = functools.partial(
        _sgu_kernel, c_real=float(C), s_real=S, sp=Sp, ts=TS,
        w_resident=w_resident, gate_in_f32=gate_in_f32)

    out_p = pl.pallas_call(
        kernel,
        out_shape=jax.ShapeDtypeStruct((B, Sp, Cp), x.dtype),
        grid_spec=pltpu.PrefetchScalarGridSpec(
            num_scalar_prefetch=0,
            grid=(B, n_s),
            in_specs=[
                u_spec,
                v_spec,
                pl.BlockSpec((1, Cp), lambda b, s: (0, 0)),      # gamma
                pl.BlockSpec((1, Cp), lambda b, s: (0, 0)),      # beta
                w_spec,                                          # W
                pl.BlockSpec((TS, 1), lambda b, s: (s, 0)),      # bias seq tile
            ],
            out_specs=pl.BlockSpec((1, TS, Cp), lambda b, s: (b, s, 0)),
            scratch_shapes=[pltpu.VMEM((Sp, Cp), jnp.bfloat16)],
        ),
        compiler_params=pltpu.CompilerParams(
            dimension_semantics=("parallel", "arbitrary"),
            vmem_limit_bytes=int(vmem_limit),
        ),
    )(x_in, x_in, gamma_p, beta_p, w_p, bias_p)

    if S == Sp and C == Cp:
        return out_p
    return out_p[:, :S, :C]


def _reference(x, gamma, beta, w, bias, matmul_dtype=jnp.float32):
    C = x.shape[-1] // 2
    u, v = x[..., :C], x[..., C:]
    mean = jnp.mean(v, axis=-1, keepdims=True)
    var = jnp.mean((v - mean) ** 2, axis=-1, keepdims=True)
    v = (v - mean) / jnp.sqrt(var + EPS) * gamma + beta
    v = jnp.einsum("st,btc->bsc",
                   w.astype(matmul_dtype), v.astype(matmul_dtype),
                   preferred_element_type=jnp.float32)
    v = v + bias[None, :, None]
    return u * v


if __name__ == "__main__":
    B, seq_len, d_ffn = 2, 8, 32
    C = d_ffn // 2

    key = jax.random.PRNGKey(0)
    kx, kw, kb = jax.random.split(key, 3)

    x = jax.random.normal(kx, (B, seq_len, d_ffn), dtype=jnp.float32)

    # Deterministic parameter init (matches the module's __init__ shapes).
    gamma = jnp.ones((C,), dtype=jnp.float32)          # LayerNorm weight
    beta = jnp.zeros((C,), dtype=jnp.float32)          # LayerNorm bias
    bound = 1.0 / (seq_len ** 0.5)
    w = jax.random.uniform(kw, (seq_len, seq_len), jnp.float32, -bound, bound)
    bias = jax.random.uniform(kb, (seq_len,), jnp.float32, -bound, bound)

    out = spatial_gating_unit(x, gamma, beta, w, bias)
    out = jax.block_until_ready(out)
    assert out.shape == (B, seq_len, C)

    # Tight check vs a reference that also does the seq matmul in bf16 (the
    # kernel's intentional precision choice); loose check vs pure-f32 math.
    ref_bf16 = _reference(x, gamma, beta, w, bias, matmul_dtype=jnp.bfloat16)
    ref_f32 = _reference(x, gamma, beta, w, bias)
    assert jnp.allclose(out, ref_bf16, atol=3e-2, rtol=3e-2)
    assert jnp.allclose(out, ref_f32, atol=1e-1, rtol=1e-1)

    print("KERNEL_OK")
</pallas_src>

<mosaic_0001>
module attributes {stable_mosaic.version = 11 : i64} {
  func.func @_sgu_kernel(%arg0: i32, %arg1: i32, %arg2: memref<1x128x128xf32, #tpu.memory_space<vmem>>, %arg3: memref<1x128x128xf32, #tpu.memory_space<vmem>>, %arg4: memref<1x128xf32, #tpu.memory_space<vmem>>, %arg5: memref<1x128xf32, #tpu.memory_space<vmem>>, %arg6: memref<128x128xbf16, #tpu.memory_space<vmem>>, %arg7: memref<128x1xf32, #tpu.memory_space<vmem>>, %arg8: memref<1x128x128xf32, #tpu.memory_space<vmem>>, %arg9: memref<128x128xbf16, #tpu.memory_space<vmem>>) attributes {dimension_semantics = [#tpu.dimension_semantics<parallel>, #tpu.dimension_semantics<arbitrary>], iteration_bounds = array<i64: 2, 1>, scalar_prefetch = 0 : i64, scratch_operands = 1 : i64, tpu.core_type = #tpu.core_type<tc>, window_params = [{transform_indices = @transform_0, window_bounds = array<i64: 1, 128, 128>}, {transform_indices = @transform_1, window_bounds = array<i64: 1, 128, 128>}, {pipeline_mode = #tpu.pipeline_mode<synchronous>, transform_indices = @transform_2, window_bounds = array<i64: 1, 128>}, {pipeline_mode = #tpu.pipeline_mode<synchronous>, transform_indices = @transform_3, window_bounds = array<i64: 1, 128>}, {pipeline_mode = #tpu.pipeline_mode<synchronous>, transform_indices = @transform_4, window_bounds = array<i64: 128, 128>}, {transform_indices = @transform_5, window_bounds = array<i64: 128, 1>}, {transform_indices = @transform_6, window_bounds = array<i64: 1, 128, 128>}]} {
    %c0_i32 = arith.constant 0 : i32
    %0 = arith.cmpi eq, %arg1, %c0_i32 : i32
    %1 = arith.extui %0 : i1 to i32
    %c0_i32_0 = arith.constant 0 : i32
    %2 = arith.cmpi ne, %1, %c0_i32_0 : i32
    scf.if %2 {
      %c0_11 = arith.constant 0 : index
      %c0_12 = arith.constant 0 : index
      %c0_13 = arith.constant 0 : index
      %18 = vector.load %arg3[%c0_11, %c0_12, %c0_13] : memref<1x128x128xf32, #tpu.memory_space<vmem>>, vector<1x128x128xf32>
      %19 = vector.shape_cast %18 : vector<1x128x128xf32> to vector<128x128xf32>
      %cst_14 = arith.constant dense<0.000000e+00> : vector<128xf32>
      %20 = vector.multi_reduction <add>, %19, %cst_14 [1] : vector<128x128xf32> to vector<128xf32>
      %21 = vector.shape_cast %20 : vector<128xf32> to vector<128x1xf32>
      %cst_15 = arith.constant 6.250000e-02 : f32
      %22 = vector.broadcast %cst_15 : f32 to vector<128x1xf32>
      %23 = arith.mulf %21, %22 : vector<128x1xf32>
      %24 = arith.mulf %19, %19 : vector<128x128xf32>
      %cst_16 = arith.constant dense<0.000000e+00> : vector<128xf32>
      %25 = vector.multi_reduction <add>, %24, %cst_16 [1] : vector<128x128xf32> to vector<128xf32>
      %26 = vector.shape_cast %25 : vector<128xf32> to vector<128x1xf32>
      %cst_17 = arith.constant 6.250000e-02 : f32
      %27 = vector.broadcast %cst_17 : f32 to vector<128x1xf32>
      %28 = arith.mulf %26, %27 : vector<128x1xf32>
      %29 = arith.mulf %23, %23 : vector<128x1xf32>
      %30 = arith.subf %28, %29 : vector<128x1xf32>
      %cst_18 = arith.constant 0.000000e+00 : f32
      %31 = vector.broadcast %cst_18 : f32 to vector<128x1xf32>
      %32 = arith.maximumf %30, %31 : vector<128x1xf32>
      %33 = vector.broadcast %23 : vector<128x1xf32> to vector<128x128xf32>
      %34 = arith.subf %19, %33 : vector<128x128xf32>
      %cst_19 = arith.constant 9.99999974E-6 : f32
      %35 = vector.broadcast %cst_19 : f32 to vector<128x1xf32>
      %36 = arith.addf %32, %35 : vector<128x1xf32>
      %37 = math.rsqrt %36 : vector<128x1xf32>
      %38 = vector.broadcast %37 : vector<128x1xf32> to vector<128x128xf32>
      %39 = arith.mulf %34, %38 : vector<128x128xf32>
      %c0_20 = arith.constant 0 : index
      %c0_21 = arith.constant 0 : index
      %40 = vector.load %arg4[%c0_20, %c0_21] : memref<1x128xf32, #tpu.memory_space<vmem>>, vector<1x128xf32>
      %41 = vector.broadcast %40 : vector<1x128xf32> to vector<128x128xf32>
      %42 = arith.mulf %39, %41 : vector<128x128xf32>
      %c0_22 = arith.constant 0 : index
      %c0_23 = arith.constant 0 : index
      %43 = vector.load %arg5[%c0_22, %c0_23] : memref<1x128xf32, #tpu.memory_space<vmem>>, vector<1x128xf32>
      %44 = vector.broadcast %43 : vector<1x128xf32> to vector<128x128xf32>
      %45 = arith.addf %42, %44 : vector<128x128xf32>
      %46 = tpu.iota {dimensions = array<i32: 0>} : vector<128x128xi32>
      %c8_i32 = arith.constant 8 : i32
      %47 = vector.broadcast %c8_i32 : i32 to vector<128x128xi32>
      %48 = arith.cmpi slt, %46, %47 : vector<128x128xi32>
      %cst_24 = arith.constant 0.000000e+00 : f32
      %49 = vector.broadcast %cst_24 : f32 to vector<128x128xf32>
      %50 = arith.select %48, %45, %49 : vector<128x128xi1>, vector<128x128xf32>
      %51 = arith.truncf %50 : vector<128x128xf32> to vector<128x128xbf16>
      %c0_25 = arith.constant 0 : index
      %c0_26 = arith.constant 0 : index
      %52 = vector.load %arg9[%c0_25, %c0_26] : memref<128x128xbf16, #tpu.memory_space<vmem>>, vector<128x128xbf16>
      tpu.vector_store %arg9[%c0_25, %c0_26], %51 {strides = array<i32>} : memref<128x128xbf16, #tpu.memory_space<vmem>>, vector<128x128xbf16>,
    } else {
    }
    %c128_i32 = arith.constant 128 : i32
    %3 = arith.muli %arg1, %c128_i32 : i32
    %4 = tpu.assume_multiple %3, 128 : i32
    %5 = arith.index_cast %4 : i32 to index
    %c0 = arith.constant 0 : index
    %6 = vector.load %arg6[%5, %c0] : memref<128x128xbf16, #tpu.memory_space<vmem>>, vector<128x128xbf16>
    %c0_1 = arith.constant 0 : index
    %c0_2 = arith.constant 0 : index
    %7 = vector.load %arg9[%c0_1, %c0_2] : memref<128x128xbf16, #tpu.memory_space<vmem>>, vector<128x128xbf16>
    %cst = arith.constant dense<0.000000e+00> : vector<128x128xf32>
    %8 = tpu.matmul %6, %7, %cst {dimension_numbers = #tpu.dot_dimension_numbers<[1], [0], [0], [1], [0, 0, 1, 1], [], []>} : vector<128x128xbf16>, vector<128x128xbf16>, vector<128x128xf32> -> vector<128x128xf32>
    %c0_3 = arith.constant 0 : index
    %c0_4 = arith.constant 0 : index
    %9 = vector.load %arg7[%c0_3, %c0_4] : memref<128x1xf32, #tpu.memory_space<vmem>>, vector<128x1xf32>
    %10 = vector.broadcast %9 : vector<128x1xf32> to vector<128x128xf32>
    %11 = arith.addf %8, %10 : vector<128x128xf32>
    %c0_5 = arith.constant 0 : index
    %c0_6 = arith.constant 0 : index
    %c0_7 = arith.constant 0 : index
    %12 = vector.load %arg2[%c0_5, %c0_6, %c0_7] : memref<1x128x128xf32, #tpu.memory_space<vmem>>, vector<1x128x128xf32>
    %13 = vector.shape_cast %12 : vector<1x128x128xf32> to vector<128x128xf32>
    %14 = arith.mulf %13, %11 : vector<128x128xf32>
    %c0_8 = arith.constant 0 : index
    %c0_9 = arith.constant 0 : index
    %c0_10 = arith.constant 0 : index
    %15 = vector.load %arg8[%c0_8, %c0_9, %c0_10] : memref<1x128x128xf32, #tpu.memory_space<vmem>>, vector<1x128x128xf32>
    %16 = vector.shape_cast %15 : vector<1x128x128xf32> to vector<128x128xf32>
    %17 = vector.shape_cast %14 : vector<128x128xf32> to vector<1x128x128xf32>
    tpu.vector_store %arg8[%c0_8, %c0_9, %c0_10], %17 {strides = array<i32>} : memref<1x128x128xf32, #tpu.memory_space<vmem>>, vector<1x128x128xf32>,
    return
  }
  func.func @transform_0(%arg0: i32, %arg1: i32) -> (i32, i32, i32) {
    %c0_i32 = arith.constant 0 : i32
    %c0_i32_0 = arith.constant 0 : i32
    return %arg0, %arg1, %c0_i32 : i32, i32, i32
  }
  func.func @transform_1(%arg0: i32, %arg1: i32) -> (i32, i32, i32) {
    %c0_i32 = arith.constant 0 : i32
    %c1_i32 = arith.constant 1 : i32
    %c0_i32_0 = arith.constant 0 : i32
    return %arg0, %c0_i32, %c1_i32 : i32, i32, i32
  }
  func.func @transform_2(%arg0: i32, %arg1: i32) -> (i32, i32) {
    %c0_i32 = arith.constant 0 : i32
    %c0_i32_0 = arith.constant 0 : i32
    %c0_i32_1 = arith.constant 0 : i32
    return %c0_i32, %c0_i32_0 : i32, i32
  }
  func.func @transform_3(%arg0: i32, %arg1: i32) -> (i32, i32) {
    %c0_i32 = arith.constant 0 : i32
    %c0_i32_0 = arith.constant 0 : i32
    %c0_i32_1 = arith.constant 0 : i32
    return %c0_i32, %c0_i32_0 : i32, i32
  }
  func.func @transform_4(%arg0: i32, %arg1: i32) -> (i32, i32) {
    %c0_i32 = arith.constant 0 : i32
    %c0_i32_0 = arith.constant 0 : i32
    %c0_i32_1 = arith.constant 0 : i32
    return %c0_i32, %c0_i32_0 : i32, i32
  }
  func.func @transform_5(%arg0: i32, %arg1: i32) -> (i32, i32) {
    %c0_i32 = arith.constant 0 : i32
    %c0_i32_0 = arith.constant 0 : i32
    return %arg1, %c0_i32 : i32, i32
  }
  func.func @transform_6(%arg0: i32, %arg1: i32) -> (i32, i32, i32) {
    %c0_i32 = arith.constant 0 : i32
    %c0_i32_0 = arith.constant 0 : i32
    return %arg0, %arg1, %c0_i32 : i32, i32, i32
  }
}

</mosaic_0001>

<bundles_post_ra>
// kernel: tpu_custom_call.1
= control target key start
LH: loop header
LB: loop body
LE: loop exit
PB: predicated region body
PF: predicated region fallthrough
CT: control target
= control target key end

     0   :  { %s1880_s0 = inlined_call_operand.hbm [shape: f32[2,128,256], index: 0, kind: input, shape index: {}]   ;;  %s1881_s1 = inlined_call_operand.hbm [shape: f32[2,128,256], index: 1, kind: input, shape index: {}]   ;;  %s1882_s2 = inlined_call_operand.vmem [shape: f32[1,128], index: 2, kind: input, shape index: {}]   ;;  %s1883_s3 = inlined_call_operand.vmem [shape: f32[1,128], index: 3, kind: input, shape index: {}]   ;;  %s1884_s4 = inlined_call_operand.vmem [shape: bf16[128,128], index: 4, kind: input, shape index: {}]   ;;  %s1885_s5 = inlined_call_operand.vmem [shape: f32[128,1], index: 5, kind: input, shape index: {}]   ;;  %s1886_s6 = inlined_call_operand.hbm [shape: f32[2,128,128], index: 6, kind: output, shape index: {}]  }
   0x1   :  { %1893 = sst [smem:[#allocation15_spill]] %s1880_s0 }
   0x2   :  { %11 = vsyncpa [#allocation4], 0 }
   0x3   :  { %13 = vsyncpa [#allocation4 + $0x1], 0 }
   0x4   :  { %14 = vsyncpa [#allocation7], 0 }
   0x5   :  { %16 = vsyncpa [#allocation7 + $0x1], 0 }
   0x6   :  { %17 = vsyncpa [#allocation5], 0 }
   0x7   :  { %19 = vsyncpa [#allocation5 + $0x1], 0  ;;  %s1515_s21 = smov 0   ;;  %s1517_s22 = smov 0  }
   0x8   :  { %s1519_s23 = smov 0   ;;  %s1521_s24 = smov 0  }
   0x9   :  { %s1523_s25 = smov 0   ;;  %s1525_s26 = smov 0  }
   0xa LB: > { %1894 = sst [smem:[#allocation12_spill]] %s1456_s23  ;;  %s1173_s27 = sadd.s32 4294967295, %s1468_s26   ;;  %s1468_s26 = sphi %s1525_s26, %s25_s26   ;;  %s1464_s25 = sphi %s1523_s25, %s1916_s25   ;;  %s1460_s24 = sphi %s1521_s24, %s1915_s24   ;;  %s1456_s23 = sphi %s1519_s23, %s1911_s23   ;;  %s1452_s22 = sphi %s1517_s22, %s1914_s22   ;;  %s1448_s21 = sphi %s1515_s21, %s1913_s21  }
   0xb   : > { %s1174_s28 = sadd.s32 4294967294, %s1468_s26   ;;  %s37_s29 = sadd.s32 1, %s1464_s25 }
   0xc   : > { %s46_s30 = sadd.s32 1, %s1456_s23  ;;  %p39_p0 = scmp.ge.s32.totalorder %s37_s29, 2 }
   0xd   : > { %p53_p1 = scmp.ne.s32.totalorder %s1456_s23, %s1452_s22  ;;  %p54_p2 = scmp.eq.s32.totalorder %s1468_s26, 0 }
   0xe   : > { %p59_p3 = scmp.ne.s32.totalorder %s1452_s22, %s1448_s21  ;;  %s1918_s29 = smov (%p39_p0, %s37_s29), 0 }
   0xf   : > { %1895 = sst [smem:[#allocation13_spill]] %s1918_s29  ;;  %p1556_p4 = por %p54_p2, %p53_p1 }
  0x10   : > { %p60_p5 = scmp.eq.s32.totalorder %s1173_s27, 0  ;;  %s41_s8 = ssub.s32 %s1464_s25, %s1918_s29 }
  0x11   : > { %p200_p6 = scmp.eq.s32.totalorder %s1173_s27, 1  ;;  %p44_p7 = scmp.eq.s32.totalorder %s41_s8, 0 }
  0x12   : > { %p1562_p8 = por %p60_p5, %p59_p3  ;;  %p206_p10 = scmp.eq.s32.totalorder %s1174_s28, 1 }
  0x13   : > { %p1566_p9 = por %p200_p6, %p53_p1  ;;  %p1252_p13 = scmp.lt.s32.totalorder %s1468_s26, 2 }
  0x14   : > { %s1897_s9 = scalar_select %p1562_p8, 1, 0 }
  0x15   : > { %s1898_s10 = scalar_select %p1566_p9, 1, 0 }
  0x16   : > { %s1571_s11 = scalar_select %p44_p7, %s1456_s23, %s46_s30  }
  0x17   : > { %p1573_p11 = por %p206_p10, %p59_p3  ;;  %s1580_s13 = sand.u32 1, %s1456_s23  }
  0x18   : > { %1899 = sst [smem:[#allocation14_spill]] %s1571_s11  ;;  %s1887_s14 = sshll.u32 %s1580_s13, 7 }
  0x19   : > { %s1900_s12 = scalar_select %p1573_p11, 1, 0 }
  0x1a   : > { %s1203_s15 = sshll.u32 %s1464_s25, 12  ;;  %s1901_s0 = sld [smem:[#allocation15_spill]] }
  0x1b   : > { %s248_s19 = scalar_lea.vmem [#allocation3], %s1887_s14  ;;  %p1597_p0 = pnand %p1252_p13, %p1556_p4 }
  0x1c   : > { %s258_s20 = sshll.u32 %s248_s19, 4  ;;  %s245_s28 = scalar_lea.sflag [#allocation4], %s1580_s13  ;;  %s1593_s20 = int_to_ptr.vmem [resolvable:$true] %s258_s20 }
  0x1d   : > { %p1323_p2 = pneg %p1597_p0 }
  0x20   : > { %s1589_s18 = scalar_lea.hbm %s1901_s0, %s1203_s15  ;;  %s1326_s17 = scalar_lea.hbm %s1901_s0, 8192 }
  0x21   : > { %s1321_s30 = scalar_lea.hbm %s1589_s18, 2048  ;;  %p1327_p4 = scmp.lt.u32.totalorder %s1589_s18, %s1901_s0 }
  0x22   : > { %p1322_p1 = scmp.ne.s32.totalorder %s1589_s18, %s1321_s30  ;;  %p1328_p6 = scmp.lt.u32.totalorder %s1326_s17, %s1321_s30 }
  0x23   : > { %p1330_p10 = scmp.lt.u32.totalorder %s1321_s30, %s1589_s18 }
  0x24   : > { %p1324_p3 = pnand %p1323_p2, %p1322_p1  ;;  %p1329_p7 = por %p1328_p6, %p1327_p4 }
  0x26   : > { %p1325_p5 = pneg %p1324_p3  ;;  %p1331_p13 = por %p1330_p10, %p1329_p7 }
  0x28   : > { %p1332_p12 = pnand %p1331_p13, %p1325_p5 }
  0x2a   : > { %1335 = shalt.err (!%p1332_p12)
}
  0x2b   : > { %s1336_s14 = scalar_lea.vmem %s1593_s20, 2048  ;;  %s1470_s8 = smov [#allocation3]  }
  0x2c   : > { %p1337_p1 = scmp.ne.s32.totalorder %s1593_s20, %s1336_s14  ;;  %s1341_s16 = sshll.u32 %s1470_s8, 4  ;;  %s1342_s16 = int_to_ptr.vmem [resolvable:$false] %s1341_s16 }
  0x2d   : > { %s1343_s7 = scalar_lea.vmem %s1342_s16, 4096  ;;  %p1344_p9 = scmp.lt.s32.totalorder %s1593_s20, %s1342_s16 }
  0x2e   : > { %p1339_p3 = pnand %p1337_p1, %p1323_p2  ;;  %p1345_p4 = scmp.lt.s32.totalorder %s1343_s7, %s1336_s14 }
  0x30   : > { %p1340_p11 = pneg %p1339_p3  ;;  %p1346_p6 = por %p1345_p4, %p1344_p9 }
  0x32   : > { %p1347_p7 = pnand %p1346_p6, %p1340_p11 }
  0x34   : > { %1350 = shalt.err (!%p1347_p7)
}
  0x35   : > { %s1891_s30 = smov 256   ;;  %s1472_s17 = smov 128  }
  0x36   : > { %s1473_s19 = smov 8   ;;  %p1184_p9 = scmp.ge.s32.totalorder %s1468_s26, 1 }
  0x37   : > { %1244 = dma.hbm_to_vmem [thread:$0]  (!%p1597_p0), %s1589_s18, 2048, %s1593_s20, %s245_s28, %s1891_s30, %s1472_s17, %s1473_s19  }
  0x38   : > { %p288_p11 = scmp.lt.s32.totalorder %s1468_s26, 3  ;;  %s1089_s7 = scalar_lea.hbm %s1881_s1, %s1203_s15 }
  0x39   : > { %s1643_s0 = scalar_lea.hbm %s1089_s7, 128  ;;  %s1904_s29 = sshll.u32 %s1580_s13, 7 }
  0x3a   : > { %p1634_p12 = pnand %p1184_p9, %p288_p11  ;;  %s272_s11 = scalar_lea.vmem [#allocation6], %s1904_s29 }
  0x3b   : > { %s280_s23 = sshll.u32 %s272_s11, 4  ;;  %s269_s18 = scalar_lea.sflag [#allocation7], %s1580_s13  ;;  %s1647_s23 = int_to_ptr.vmem [resolvable:$true] %s280_s23 }
  0x3c   : > { %s1381_s20 = scalar_lea.hbm %s1089_s7, 2176  ;;  %s1356_s15 = scalar_lea.hbm %s1881_s1, 8192 }
  0x3d   : > { %p1352_p5 = scmp.ne.s32.totalorder %s1643_s0, %s1381_s20  ;;  %p1357_p1 = scmp.lt.u32.totalorder %s1643_s0, %s1881_s1 }
  0x3e   : > { %p1358_p3 = scmp.lt.u32.totalorder %s1356_s15, %s1381_s20  ;;  %p1360_p6 = scmp.lt.u32.totalorder %s1381_s20, %s1643_s0 }
  0x3f   : > { %p1354_p10 = pnand %p1352_p5, %p1323_p2 }
  0x40   : > { %p1359_p4 = por %p1358_p3, %p1357_p1 }
  0x41   : > { %p1355_p13 = pneg %p1354_p10 }
  0x42   : > { %p1361_p7 = por %p1360_p6, %p1359_p4 }
  0x44   : > { %p1362_p9 = pnand %p1361_p7, %p1355_p13 }
  0x46   : > { %1365 = shalt.err (!%p1362_p9)
}
  0x47   : > { %s1366_s29 = scalar_lea.vmem %s1647_s23, 2048  ;;  %s1474_s11 = smov [#allocation6]  }
  0x48   : > { %p1367_p11 = scmp.ne.s32.totalorder %s1647_s23, %s1366_s29  ;;  %s1371_s7 = sshll.u32 %s1474_s11, 4  ;;  %s1372_s7 = int_to_ptr.vmem [resolvable:$false] %s1371_s7 }
  0x49   : > { %s1373_s30 = scalar_lea.vmem %s1372_s7, 4096  ;;  %p1374_p8 = scmp.lt.s32.totalorder %s1647_s23, %s1372_s7 }
  0x4a   : > { %p1369_p5 = pnand %p1367_p11, %p1323_p2  ;;  %p1375_p1 = scmp.lt.s32.totalorder %s1373_s30, %s1366_s29 }
  0x4c   : > { %p1370_p10 = pneg %p1369_p5  ;;  %p1376_p3 = por %p1375_p1, %p1374_p8 }
  0x4e   : > { %p1377_p4 = pnand %p1376_p3, %p1370_p10 }
  0x50   : > { %1380 = shalt.err (!%p1377_p4)
}
  0x51   : > { %s1905_s20 = smov 256   ;;  %292 = sbr.rel (%p1634_p12) target bundleno = 511 (0x1ff), region = 44 }
  0x52   : > { %1247 = dma.hbm_to_vmem [thread:$0]  (!%p1597_p0), %s1643_s0, 2048, %s1647_s23, %s269_s18, %s1905_s20, %s1472_s17, %s1473_s19  }
  0x53   : > { %s1680_s28 = sand.u32 (!%p1634_p12), 1, %s1452_s22   ;;  %p1906_p8 = scmp.ne.s32.totalorder (!%p1634_p12), %s1897_s9, 0 }
  0x54   : > { %s1683_s8 = sshll.u32 (!%p1634_p12), %s1680_s28, 7  ;;  %s295_s27 = scalar_lea.sflag (!%p1634_p12), [#allocation4], %s1680_s28 }
  0x55   : > { %s1687_s15 = scalar_lea.vmem (!%p1634_p12), [#allocation3], %s1683_s8 }
  0x58   : > { %1435 = dma.done.wait (%p1906_p8), %s295_s27, 2048  }
  0x59   : > { %1437 = vsyncadd (%p1906_p8), %s295_s27, 4294965248  ;;  %s304_s0 = scalar_lea.sflag [#allocation7], %s1680_s28  ;;  %s307_s23 = scalar_lea.vmem [#allocation6], %s1683_s8 }
  0x5a   : > { %1439 = dma.done.wait (%p1906_p8), %s304_s0, 2048  }
  0x5b   : > { %1441 = vsyncadd (%p1906_p8), %s304_s0, 4294965248  ;;  %v359_v0 = vld [vmem:[%s307_s23] sm:$0xff]  ;;  %v1475_v3 = vmov 0   ;;  %v740_v4 = vld [vmem:[%s1885_s5 + $0x8] sm:$0xff]  ;;  %v1476_v36 = vmov 0.0   ;;  %s1794_s29 = scalar_lea.vmem [#allocation8], %s1683_s8 }
  0x5c   : > { %375 = vadd.xlane.f32.xlu0 %v359_v0  ;;  %v423_v1 = vmul.f32 %v359_v0, %v359_v0  ;;  %v739_v2 = vld [vmem:[%s1885_s5] sm:$0xff]  ;;  %1309 = vset.pattern.permute.xlu1 %v1475_v3  ;;  %v742_v5 = vld [vmem:[%s1885_s5 + $0x18] sm:$0xff]  ;;  %v744_v9 = vld [vmem:[%s1885_s5 + $0x28] sm:$0xff]  ;;  %s1205_s8 = sshll.u32 %s1460_s24, 11  ;;  %s1044_s11 = sshll.u32 %s1794_s29, 4  ;;  %s1825_s11 = int_to_ptr.vmem [resolvable:$true] %s1044_s11 }
  0x5d   : > { %1310 = vset.pattern.permute.xlu0 %v1475_v3  ;;  %757 = vperm.xlu1 %1309, %v739_v2   ;;  %v1311_v6 = vld [vmem:[%s1884_s4] sm:$0xff]   ;;  %v745_v10 = vld [vmem:[%s1885_s5 + $0x30] sm:$0xff]  ;;  %v746_v11 = vld [vmem:[%s1885_s5 + $0x38] sm:$0xff]  ;;  %s1823_s30 = scalar_lea.hbm %s1886_s6, %s1205_s8  ;;  %s1382_s20 = scalar_lea.vmem %s1825_s11, 2048 }
  0x5e   : > { %v1312_v7 = vld [vmem:[%s1884_s4 + $0x20] sm:$0xff]   ;;  %1217 = vmatprep.mubr.bf16.mxu0 %v1311_v6  ;;  %v741_v12 = vld [vmem:[%s1885_s5 + $0x10] sm:$0xff]  ;;  %v748_v15 = vld [vmem:[%s1885_s5 + $0x48] sm:$0xff]  ;;  %p1383_p0 = scmp.ne.s32.totalorder %s1825_s11, %s1382_s20  ;;  %p1907_p2 = scmp.ne.s32.totalorder %s1898_s10, 0 }
  0x5f   : > { %1225 = vmatprep.mubr.bf16.mxu1 %v1312_v7  ;;  %v743_v8 = vld [vmem:[%s1885_s5 + $0x20] sm:$0xff]  ;;  %v753_v13 = vld [vmem:[%s1885_s5 + $0x70] sm:$0xff]  ;;  %v750_v17 = vld [vmem:[%s1885_s5 + $0x58] sm:$0xff]  ;;  %s1477_s27 = smov [#allocation8]  }
  0x60   : > { %439 = vadd.xlane.f32.xlu0 %v423_v1  ;;  %v747_v14 = vld [vmem:[%s1885_s5 + $0x40] sm:$0xff]  ;;  %v749_v16 = vld [vmem:[%s1885_s5 + $0x50] sm:$0xff]  ;;  %v752_v19 = vld [vmem:[%s1885_s5 + $0x68] sm:$0xff]  ;;  %p1384_p12 = pnand %p1383_p0, %p1907_p2  ;;  %s1386_s0 = sshll.u32 %s1477_s27, 4  ;;  %s1387_s0 = int_to_ptr.vmem [resolvable:$false] %s1386_s0 }
  0x61   : > { %762 = vperm.xlu1 %1309, %v740_v4   ;;  %v751_v18 = vld [vmem:[%s1885_s5 + $0x60] sm:$0xff]  ;;  %v754_v20 = vld [vmem:[%s1885_s5 + $0x78] sm:$0xff]  ;;  %v1313_v38 = vld [vmem:[%s1884_s4 + $0x8] sm:$0xff]   ;;  %s1388_s23 = scalar_lea.vmem %s1387_s0, 4096  ;;  %p1389_p6 = scmp.lt.s32.totalorder %s1825_s11, %s1387_s0 }
  0x62   : > { %v1188_v31 = vld [vmem:[%s1882_s2] ss:$0 sm:$0xff]  ;;  %v1314_v39 = vld [vmem:[%s1884_s4 + $0x28] sm:$0xff]   ;;  %v1315_v40 = vld [vmem:[%s1884_s4 + $0x10] sm:$0xff]   ;;  %p1385_p13 = pneg %p1384_p12  ;;  %p1390_p7 = scmp.lt.s32.totalorder %s1388_s23, %s1382_s20 }
  0x63   : > { %v1189_v33 = vld [vmem:[%s1883_s3] ss:$0 sm:$0xff]  ;;  %v1316_v41 = vld [vmem:[%s1884_s4 + $0x30] sm:$0xff]   ;;  %v1317_v42 = vld [vmem:[%s1884_s4 + $0x18] sm:$0xff]  }
  0x64   : > { %v1318_v43 = vld [vmem:[%s1884_s4 + $0x38] sm:$0xff]   ;;  %v990_v60 = vld [vmem:[%s1687_s15 + $0x50] sm:$0xff]  ;;  %v980_v1 = vld [vmem:[%s1687_s15] sm:$0xff]  ;;  %p1391_p9 = por %p1390_p7, %p1389_p6 }
  0x65   : > { %772 = vperm.xlu1 %1309, %v742_v5   ;;  %v982_v61 = vld [vmem:[%s1687_s15 + $0x10] sm:$0xff]  ;;  %v988_v3 = vld [vmem:[%s1687_s15 + $0x40] sm:$0xff]  ;;  %v983_v7 = vld [vmem:[%s1687_s15 + $0x18] sm:$0xff] }
  0x66   : > { %p1392_p11 = pnand %p1391_p9, %p1385_p13 }
  0x69   : > { %777 = vperm.xlu1 %1309, %v743_v8  }
  0x6d   : > { %782 = vperm.xlu1 %1309, %v744_v9   ;;  %v991_v9 = vld [vmem:[%s1687_s15 + $0x58] sm:$0xff] }
  0x71   : > { %787 = vperm.xlu1 %1309, %v745_v10  }
  0x75   : > { %792 = vperm.xlu1 %1309, %v746_v11  }
  0x76   : > { %767 = vperm.xlu0 %1310, %v741_v12  }
  0x79   : > { %797 = vperm.xlu1 %1309, %v747_v14  }
  0x7a   : > { %827 = vperm.xlu0 %1310, %v753_v13  }
  0x7d   : > { %802 = vperm.xlu1 %1309, %v748_v15   ;;  %v981_v15 = vld [vmem:[%s1687_s15 + $0x8] sm:$0xff] }
  0x81   : > { %807 = vperm.xlu1 %1309, %v749_v16  }
  0x85   : > { %812 = vperm.xlu1 %1309, %v750_v17   ;;  %v989_v17 = vld [vmem:[%s1687_s15 + $0x48] sm:$0xff] }
  0x89   : > { %817 = vperm.xlu1 %1309, %v751_v18  }
  0x8d   : > { %822 = vperm.xlu1 %1309, %v752_v19  }
  0x91   : > { %832 = vperm.xlu1 %1309, %v754_v20  }
  0xdc   : > { %v758_v44 = vpop.permute.xlu1 %757 }
  0xe0   : > { %v763_v45 = vpop.permute.xlu1 %762 }
  0xe4   : > { %v773_v46 = vpop.permute.xlu1 %772 }
  0xe8   : > { %v1777_v47 = vpop.permute.xlu1 %777 }
  0xe9   : > { %v376_v21 = vpop.xlane.xlu0 %375 }
  0xea   : > { %v407_v22 = vmul.f32 0.0625, %v376_v21 }
  0xec   : > { %v487_v24 = vmul.f32 %v407_v22, %v407_v22  ;;  %v535_v29 = vsub.f32 %v359_v0, %v407_v22  ;;  %v1779_v48 = vpop.permute.xlu1 %782 }
  0xed   : > { %v440_v23 = vpop.xlane.xlu0 %439 }
  0xee   : > { %v471_v25 = vmul.f32 0.0625, %v440_v23 }
  0xf0   : > { %v503_v26 = vsub.f32 %v471_v25, %v487_v24  ;;  %v788_v49 = vpop.permute.xlu1 %787 }
  0xf2   : > { %v519_v27 = vmax.f32 %v503_v26, 0.0 }
  0xf4   : > { %v551_v28 = vadd.f32 1e-05, %v519_v27  ;;  %v1781_v50 = vpop.permute.xlu1 %792 }
  0xf5   : > { %v768_v56 = vpop.permute.xlu0 %767 }
  0xf6   : > { %1319 = vrsqrt.f32 %v551_v28 }
  0xf8   : > { %v798_v51 = vpop.permute.xlu1 %797 }
  0xf9   : > { %v828_v26 = vpop.permute.xlu0 %827 }
  0xfc   : > { %v803_v52 = vpop.permute.xlu1 %802 }
 0x100   : > { %v1320_v30 = vpop.eup %1319  ;;  %v808_v53 = vpop.permute.xlu1 %807 }
 0x101   : > { %v583_v32 = vmul.f32 %v1320_v30, %v535_v29  ;;  %v986_v29 = vld [vmem:[%s1687_s15 + $0x30] sm:$0xff] }
 0x103   : > { %v606_v34 = vmul.f32 %v1188_v31, %v583_v32  ;;  %v994_v31 = vld [vmem:[%s1687_s15 + $0x70] sm:$0xff] }
 0x104   : > { %v813_v54 = vpop.permute.xlu1 %812 }
 0x105   : > { %v629_v35 = vadd.f32 %v1189_v33, %v606_v34 }
 0x107   : > { %v694_v37 = vpack.c.bf16 %v1476_v36, %v629_v35  ;;  %v984_v35 = vld [vmem:[%s1687_s15 + $0x20] sm:$0xff] }
 0x108   : > { %v818_v55 = vpop.permute.xlu1 %817 }
 0x109   : > { %1215 = vmatprep.subr.bf16.mxu0 %v694_v37  ;;  %1233 = vmatprep.subr.bf16.mxu1 %v694_v37 }
 0x10a   : > { %1216 = vmatpush3.bf16.msra.mxu0 %v694_v37  ;;  %1234 = vmatpush3.bf16.msra.mxu1 %v694_v37  ;;  %v992_v37 = vld [vmem:[%s1687_s15 + $0x60] sm:$0xff] }
 0x10c   : > { %v1783_v57 = vpop.permute.xlu1 %822 }
 0x10d   : > { %1218 = vmatmul.mubr.bf16.vlgmr.msra.gmra.mrb[0].mxu0 %v1313_v38  ;;  %1226 = vmatmul.mubr.bf16.vlgmr.msra.gmra.mrb[0].mxu1 %v1314_v39 }
 0x10e   : > { %1221 = vmatprep.mubr.bf16.mxu0 %v1315_v40  ;;  %1229 = vmatprep.mubr.bf16.mxu1 %v1316_v41  ;;  %v987_v41 = vld [vmem:[%s1687_s15 + $0x38] sm:$0xff] }
 0x110   : > { %v833_v27 = vpop.permute.xlu1 %832 }
 0x115   : > { %1222 = vmatmul.mubr.bf16.gmra.mrb[4].mxu0 %v1317_v42  ;;  %1230 = vmatmul.mubr.bf16.gmra.mrb[4].mxu1 %v1318_v43  ;;  %v995_v43 = vld [vmem:[%s1687_s15 + $0x78] sm:$0xff] }
 0x1e0   : > { %v1219_v58 = vpop.f32.mrb[0].mxu0  ;;  %v1227_v59 = vpop.f32.mrb[0].mxu1 }
 0x1e1   : > { %v958_v62 = vadd.f32 %v1227_v59, %v808_v53  ;;  %v926_v63 = vadd.f32 %v1219_v58, %v768_v56  ;;  %v917_v0 = vpop.f32.mrb[1].mxu0  ;;  %v949_v2 = vpop.f32.mrb[1].mxu1 }
 0x1e2   : > { %v918_v4 = vadd.f32 %v917_v0, %v758_v44  ;;  %v950_v5 = vadd.f32 %v949_v2, %v798_v51  ;;  %v1220_v6 = vpop.f32.mrb[2].mxu0  ;;  %v1228_v8 = vpop.f32.mrb[2].mxu1 }
 0x1e3   : > { %v1006_v10 = vmul.f32 %v990_v60, %v958_v62  ;;  %v998_v11 = vmul.f32 %v982_v61, %v926_v63  ;;  %v929_v12 = vadd.f32 %v1220_v6, %v773_v46  ;;  %v961_v13 = vadd.f32 %v1228_v8, %v813_v54  ;;  %v920_v14 = vpop.f32.mrb[3].mxu0  ;;  %v952_v16 = vpop.f32.mrb[3].mxu1 }
 0x1e4   : > { %v996_v18 = vmul.f32 %v980_v1, %v918_v4  ;;  %v1004_v19 = vmul.f32 %v988_v3, %v950_v5  ;;  %v921_v20 = vadd.f32 %v920_v14, %v763_v45  ;;  %v953_v21 = vadd.f32 %v952_v16, %v803_v52  ;;  %v985_v52 = vld [vmem:[%s1687_s15 + $0x28] sm:$0xff] }
 0x1e5   : > { %1022 = vst [vmem:[%s1794_s29 + $0x50] sm:$0xff] %v1006_v10  ;;  %1014 = vst [vmem:[%s1794_s29 + $0x10] sm:$0xff] %v998_v11  ;;  %v999_v22 = vmul.f32 %v983_v7, %v929_v12  ;;  %v1007_v23 = vmul.f32 %v991_v9, %v961_v13 }
 0x1e6   : > { %1012 = vst [vmem:[%s1794_s29] sm:$0xff] %v996_v18  ;;  %1020 = vst [vmem:[%s1794_s29 + $0x40] sm:$0xff] %v1004_v19  ;;  %v997_v24 = vmul.f32 %v981_v15, %v921_v20  ;;  %v1005_v25 = vmul.f32 %v989_v17, %v953_v21 }
 0x1e7   : > { %1015 = vst [vmem:[%s1794_s29 + $0x18] sm:$0xff] %v999_v22  ;;  %1023 = vst [vmem:[%s1794_s29 + $0x58] sm:$0xff] %v1007_v23 }
 0x1e8   : > { %1013 = vst [vmem:[%s1794_s29 + $0x8] sm:$0xff] %v997_v24  ;;  %1021 = vst [vmem:[%s1794_s29 + $0x48] sm:$0xff] %v1005_v25  ;;  %v1223_v28 = vpop.f32.mrb[4].mxu0  ;;  %v1231_v30 = vpop.f32.mrb[4].mxu1 }
 0x1e9   : > { %v942_v32 = vadd.f32 %v1223_v28, %v788_v49  ;;  %v974_v33 = vadd.f32 %v1231_v30, %v828_v26  ;;  %v933_v34 = vpop.f32.mrb[5].mxu0  ;;  %v965_v36 = vpop.f32.mrb[5].mxu1 }
 0x1ea   : > { %v934_v38 = vadd.f32 %v933_v34, %v1777_v47  ;;  %v966_v39 = vadd.f32 %v965_v36, %v818_v55  ;;  %v1224_v40 = vpop.f32.mrb[6].mxu0  ;;  %v1232_v42 = vpop.f32.mrb[6].mxu1  ;;  %v993_v47 = vld [vmem:[%s1687_s15 + $0x68] sm:$0xff]  ;;  %s1029_s15 = scalar_lea.sflag [#allocation5], %s1680_s28 }
 0x1eb   : > { %v1002_v44 = vmul.f32 %v986_v29, %v942_v32  ;;  %v1010_v45 = vmul.f32 %v994_v31, %v974_v33  ;;  %v945_v46 = vadd.f32 %v1224_v40, %v1781_v50  ;;  %v977_v49 = vadd.f32 %v1232_v42, %v833_v27  ;;  %v936_v51 = vpop.f32.mrb[7].mxu0  ;;  %v968_v53 = vpop.f32.mrb[7].mxu1 }
 0x1ec   : > { %v1000_v54 = vmul.f32 %v984_v35, %v934_v38  ;;  %v1008_v55 = vmul.f32 %v992_v37, %v966_v39  ;;  %v937_v56 = vadd.f32 %v936_v51, %v1779_v48  ;;  %v969_v58 = vadd.f32 %v968_v53, %v1783_v57 }
 0x1ed   : > { %1018 = vst [vmem:[%s1794_s29 + $0x30] sm:$0xff] %v1002_v44  ;;  %1026 = vst [vmem:[%s1794_s29 + $0x70] sm:$0xff] %v1010_v45  ;;  %v1003_v50 = vmul.f32 %v987_v41, %v945_v46  ;;  %v1011_v59 = vmul.f32 %v995_v43, %v977_v49 }
 0x1ee   : > { %1016 = vst [vmem:[%s1794_s29 + $0x20] sm:$0xff] %v1000_v54  ;;  %1024 = vst [vmem:[%s1794_s29 + $0x60] sm:$0xff] %v1008_v55  ;;  %v1001_v48 = vmul.f32 %v985_v52, %v937_v56  ;;  %v1009_v60 = vmul.f32 %v993_v47, %v969_v58 }
 0x1ef   : > { %1019 = vst [vmem:[%s1794_s29 + $0x38] sm:$0xff] %v1003_v50  ;;  %1027 = vst [vmem:[%s1794_s29 + $0x78] sm:$0xff] %v1011_v59 }
 0x1f0   : > { %1017 = vst [vmem:[%s1794_s29 + $0x28] sm:$0xff] %v1001_v48  ;;  %1025 = vst [vmem:[%s1794_s29 + $0x68] sm:$0xff] %v1009_v60 }
 0x1f1   : > { %1395 = shalt.err (!%p1392_p11)
}
 0x1f2   : > { %s1396_s13 = scalar_lea.hbm %s1823_s30, 2048  ;;  %s1400_s14 = scalar_lea.hbm %s1886_s6, 4096 }
 0x1f3   : > { %p1397_p5 = scmp.ne.s32.totalorder %s1823_s30, %s1396_s13  ;;  %p1401_p3 = scmp.lt.u32.totalorder %s1823_s30, %s1886_s6 }
 0x1f4   : > { %p1402_p4 = scmp.lt.u32.totalorder %s1400_s14, %s1396_s13  ;;  %p1404_p0 = scmp.lt.u32.totalorder %s1396_s13, %s1823_s30 }
 0x1f5   : > { %p1398_p10 = pnand %p1397_p5, %p1907_p2 }
 0x1f6   : > { %p1403_p8 = por %p1402_p4, %p1401_p3 }
 0x1f7   : > { %p1399_p1 = pneg %p1398_p10 }
 0x1f8   : > { %p1405_p12 = por %p1404_p0, %p1403_p8 }
 0x1fa   : > { %p1406_p13 = pnand %p1405_p12, %p1399_p1 }
 0x1fc   : > { %1409 = shalt.err (!%p1406_p13)
}
 0x1fd   : > { %s1478_s16 = smov 128   ;;  %s1479_s29 = smov 8  }
 0x1fe   : > { %1239 = dma.vmem_to_hbm [thread:$0]  (%p1907_p2), %s1825_s11, 2048, %s1823_s30, %s1029_s15, %s1478_s16, %s1478_s16, %s1479_s29  }
 0x1ff PF: > { %s1059_s8 = sand.u32 1, %s1448_s21   ;;  %p1908_p6 = scmp.ne.s32.totalorder %s1900_s12, 0 }
 0x200   : > { %p1909_p7 = scmp.ge.s32.totalorder %s1468_s26, 2  ;;  %s1060_s24 = scalar_lea.sflag [#allocation5], %s1059_s8 }
 0x202   : > { %p1249_p9 = pnand %p1909_p7, %p1908_p6 }
 0x204   : > { %1443 = dma.done.wait (!%p1249_p9), %s1060_s24, 2048  }
 0x205   : > { %1445 = vsyncadd (!%p1249_p9), %s1060_s24, 4294965248  ;;  %s25_s26 = sadd.s32 1, %s1468_s26   ;;  %s1910_s7 = sld [smem:[#allocation12_spill]] }
 0x206   : > { %p22_p11 = scmp.ge.s32.totalorder %s25_s26, 4   ;;  %s1911_s23 = sld [smem:[#allocation14_spill]] }
 0x207   : > { %s1912_s10 = sld [smem:[#allocation13_spill]]  ;;  %s1913_s21 = smov %s1452_s22 }
 0x208   : > { %s1915_s24 = smov %s1464_s25  ;;  %24 = sbr.rel (!%p22_p11) target bundleno = 10 (0xa), region = 110 }
 0x20b   : > { %s1914_s22 = smov %s1910_s7 }
 0x20d   : > { %s1916_s25 = smov %s1912_s10 }
 0x20f   :  { %1065 = vsyncpa [#allocation4], 1 }
 0x210   :  { %1067 = vsyncpa [#allocation4 + $0x1], 1 }
 0x211   :  { %1068 = vsyncpa [#allocation7], 1 }
 0x212   :  { %1070 = vsyncpa [#allocation7 + $0x1], 1 }
 0x213   :  { %1071 = vsyncpa [#allocation5], 1 }
 0x214   :  { %1073 = vsyncpa [#allocation5 + $0x1], 1 }

</bundles_post_ra>
